<compile_context>
chip_gen: v6e
topology: v6e:2x2x1
jax: 0.10.0
libtpu: 0.0.40
codegen_flags: <defaults>
</compile_context>

<pallas_src>
import functools

import jax
import jax.numpy as jnp
from jax.experimental import pallas as pl
from jax.experimental.pallas import tpu as pltpu


def _poly_kernel(x_ref, o_ref):
    x = x_ref[...]
    # Horner form of y = 0.25 + 0.5*x - 0.125*x^2 (one fewer VALU multiply).
    o_ref[...] = 0.25 + x * (0.5 - 0.125 * x)


_SMALL_PHYS_BYTES = 2 << 20   # single-block fast path (in+out = 4 MiB of VMEM)
_MAX_LANE = 8192              # widest last dim we consider for the 2-D slab


def _round_up(v: int, m: int) -> int:
    return ((v + m - 1) // m) * m


@functools.lru_cache(maxsize=None)
def _vmem_capacity_bytes() -> int:
    """Per-TensorCore VMEM capacity; conservative (v7x-sized) if unavailable."""
    try:
        return int(pltpu.get_tpu_info().vmem_capacity_bytes)
    except Exception:
        return 64 << 20


def _block_budget() -> tuple[int, int]:
    """(target block bytes, vmem_limit_bytes) for this TPU generation."""
    cap = _vmem_capacity_bytes()
    if cap >= (96 << 20):            # v5e / v6e: 128 MiB VMEM per TensorCore
        return 16 << 20, 80 << 20
    return 8 << 20, 40 << 20         # v7x: 64 MiB VMEM per TensorCore


def _lane_width(total: int) -> int:
    """Widest last dim (<= _MAX_LANE) dividing `total`.

    Prefers multiples of 128 (lane-dense, unmasked stores); otherwise the
    largest plain divisor (masked stores, but still a single streaming pass).
    """
    for k in range(_MAX_LANE // 128, 0, -1):
        if total % (128 * k) == 0:
            return 128 * k
    for d in range(min(total, _MAX_LANE), 0, -1):
        if total % d == 0:
            return d
    return 1


def softmax_module_forward(x: jax.Array, *, donate_input: bool = False) -> jax.Array:
    """Elementwise polynomial matching the PyTorch module's forward pass."""
    orig_shape = x.shape
    dtype = x.dtype
    total = int(x.size)
    if total == 0:
        return x

    itemsize = jnp.dtype(dtype).itemsize
    lane = _lane_width(total)

    if lane < 8:
        # Near-prime flat size: one extra pad pass, then recurse (128-aligned).
        # TODO(synk): an in-kernel masked tail block would avoid this pass.
        pad = (-total) % 128
        y = softmax_module_forward(jnp.pad(x.reshape(-1), (0, pad)))
        return y[:total].reshape(orig_shape)

    rows = total // lane
    lane_p = _round_up(lane, 128)            # physical lanes per row in VMEM
    phys_bytes = rows * lane_p * itemsize    # VMEM-resident size of the slab
    x2d = x.reshape(rows, lane)              # metadata-only for contiguous data
    aliases = {0: 0} if donate_input else {}

    # ---- small fast path: one full-extent block, no grid ---------------------
    if phys_bytes <= _SMALL_PHYS_BYTES:
        out = pl.pallas_call(
            _poly_kernel,
            out_shape=jax.ShapeDtypeStruct((rows, lane), dtype),
            input_output_aliases=aliases,
        )(x2d)
        return out.reshape(orig_shape)

    # ---- main tiled path ------------------------------------------------------
    target_block_bytes, vmem_limit = _block_budget()
    sub = max(8, 32 // itemsize)             # sublanes per vreg for this dtype

    block_rows = max(target_block_bytes // (lane_p * itemsize), sub)
    block_rows = (block_rows // sub) * sub

    if block_rows >= rows:
        if rows >= 2 * sub:
            # Exact 2-way split, rounded to the sublane count, so v7x's two
            # TensorCores get balanced halves (e.g. 48/48, never 64/32).
            block_rows = _round_up(pl.cdiv(rows, 2), sub)
        else:
            block_rows = rows
    else:
        # Keep the number of grid steps even so the "parallel" axis splits
        # evenly across v7x's two TensorCores (no effect on v5e/v6e).
        n_steps = pl.cdiv(rows, block_rows)
        if n_steps % 2 == 1:
            n_steps += 1
        block_rows = max(_round_up(pl.cdiv(rows, n_steps), sub), sub)
        if pl.cdiv(rows, block_rows) > 1 and pl.cdiv(rows, block_rows) % 2 == 1:
            # Sublane rounding occasionally drops a step; nudge once more.
            n_steps = pl.cdiv(rows, block_rows) + 1
            block_rows = max(_round_up(pl.cdiv(rows, n_steps), sub), sub)

    grid = (pl.cdiv(rows, block_rows),)      # ragged last block masked by Pallas

    out2d = pl.pallas_call(
        _poly_kernel,
        out_shape=jax.ShapeDtypeStruct((rows, lane), dtype),
        grid_spec=pltpu.PrefetchScalarGridSpec(
            num_scalar_prefetch=0,
            grid=grid,
            in_specs=[pl.BlockSpec((block_rows, lane), lambda i: (i, 0))],
            out_specs=pl.BlockSpec((block_rows, lane), lambda i: (i, 0)),
        ),
        compiler_params=pltpu.CompilerParams(
            # TODO(synk): confirm in xprof that "parallel" shards this axis over
            # both v7x TensorCores; if not, switch to pltpu.CORE_PARALLEL.
            dimension_semantics=("parallel",),
            vmem_limit_bytes=vmem_limit,
        ),
        cost_estimate=pl.CostEstimate(
            flops=3 * total,
            transcendentals=0,
            bytes_accessed=2 * total * itemsize,
        ),
        input_output_aliases=aliases,
    )(x2d)
    return out2d.reshape(orig_shape)


if __name__ == "__main__":
    def reference(v):
        return 0.25 + 0.5 * v - 0.125 * jnp.power(v, 2)

    # Small NCHW-shaped input consistent with the module (single-block path).
    x = jax.random.normal(jax.random.PRNGKey(0), (2, 4, 16, 16), dtype=jnp.float32)
    y = softmax_module_forward(x)
    jax.block_until_ready(y)
    assert y.shape == x.shape and y.dtype == x.dtype
    assert jnp.allclose(y, reference(x), atol=1e-6, rtol=1e-6)

    # Larger input to exercise the tiled path (even grid, dual-TC balance).
    x2 = jax.random.normal(jax.random.PRNGKey(1), (4, 16, 128, 128), dtype=jnp.float32)
    y2 = softmax_module_forward(x2)
    jax.block_until_ready(y2)
    assert y2.shape == x2.shape and y2.dtype == x2.dtype
    assert jnp.allclose(y2, reference(x2), atol=1e-6, rtol=1e-6)

    # Odd, non-128-aligned shape (full-extent last-dim path, masked stores).
    x3 = jax.random.normal(jax.random.PRNGKey(2), (3, 5, 7, 9), dtype=jnp.float32)
    y3 = softmax_module_forward(x3)
    jax.block_until_ready(y3)
    assert y3.shape == x3.shape and y3.dtype == x3.dtype
    assert jnp.allclose(y3, reference(x3), atol=1e-6, rtol=1e-6)

    print("KERNEL_OK")
</pallas_src>

<mosaic_0001>
module attributes {stable_mosaic.version = 11 : i64} {
  func.func @_poly_kernel(%arg0: memref<1x2048xf32, #tpu.memory_space<vmem>>, %arg1: memref<1x2048xf32, #tpu.memory_space<vmem>>) attributes {dimension_semantics = [], scalar_prefetch = 0 : i64, scratch_operands = 0 : i64, tpu.core_type = #tpu.core_type<tc>} {
    %c0 = arith.constant 0 : index
    %c0_0 = arith.constant 0 : index
    %0 = vector.load %arg0[%c0, %c0_0] : memref<1x2048xf32, #tpu.memory_space<vmem>>, vector<1x2048xf32>
    %cst = arith.constant 1.250000e-01 : f32
    %1 = vector.broadcast %cst : f32 to vector<1x2048xf32>
    %2 = arith.mulf %1, %0 : vector<1x2048xf32>
    %cst_1 = arith.constant 5.000000e-01 : f32
    %3 = vector.broadcast %cst_1 : f32 to vector<1x2048xf32>
    %4 = arith.subf %3, %2 : vector<1x2048xf32>
    %5 = arith.mulf %0, %4 : vector<1x2048xf32>
    %cst_2 = arith.constant 2.500000e-01 : f32
    %6 = vector.broadcast %cst_2 : f32 to vector<1x2048xf32>
    %7 = arith.addf %6, %5 : vector<1x2048xf32>
    %c0_3 = arith.constant 0 : index
    %c0_4 = arith.constant 0 : index
    %8 = vector.load %arg1[%c0_3, %c0_4] : memref<1x2048xf32, #tpu.memory_space<vmem>>, vector<1x2048xf32>
    tpu.vector_store %arg1[%c0_3, %c0_4], %7 {strides = array<i32>} : memref<1x2048xf32, #tpu.memory_space<vmem>>, vector<1x2048xf32>,
    return
  }
}

</mosaic_0001>

<bundles_post_ra>
// kernel: tpu_custom_call.1
= control target key start
LH: loop header
LB: loop body
LE: loop exit
PB: predicated region body
PF: predicated region fallthrough
CT: control target
= control target key end

     0   :  { %6 = vsyncpa [#allocation3], 0  ;;  %s112_s0 = inlined_call_operand.hbm [shape: f32[1,2048], index: 0, kind: input, shape index: {}]   ;;  %s113_s1 = inlined_call_operand.hbm [shape: f32[1,2048], index: 1, kind: output, shape index: {}]  }
   0x1   :  { %7 = vsyncpa [#allocation4], 0  ;;  %s94_s6 = smov [#allocation2]  }
   0x2   :  { %s14_s7 = sshll.u32 %s94_s6, 4  ;;  %s15_s7 = int_to_ptr.vmem [resolvable:$true] %s14_s7 }
   0x3   :  { %s58_s8 = scalar_lea.vmem %s15_s7, 256  ;;  %p63_p1 = scmp.lt.s32.totalorder %s15_s7, %s15_s7 }
   0x4   :  { %p59_p0 = scmp.ne.s32.totalorder %s15_s7, %s58_s8  ;;  %p64_p2 = scmp.lt.s32.totalorder %s58_s8, %s58_s8 }
   0x6   :  { %p65_p3 = por %p64_p2, %p63_p1 }
   0x8   :  { %p66_p4 = pnand %p65_p3, %p59_p0 }
   0xa   :  { %69 = shalt.err (!%p66_p4)
}
   0xb   :  { %17 = dma.hbm_to_vmem [thread:$0]  %s112_s0, 256, %s15_s7, [#allocation3]  }
   0xc   :  { %90 = dma.done.wait [#allocation3], 256  }
   0xd   :  { %91 = vsyncadd [#allocation3], 4294967040  ;;  %v21_v0 = vld [vmem:[#allocation2] sm:$0xff]  ;;  %v22_v1 = vld [vmem:[#allocation2 + $0x8] sm:$0xff]  ;;  %s95_s11 = smov [#allocation5]  }
   0xe   :  { %v23_v2 = vmul.f32 0.125, %v21_v0  ;;  %v24_v3 = vmul.f32 0.125, %v22_v1  ;;  %s39_s12 = sshll.u32 %s95_s11, 4  ;;  %s40_s12 = int_to_ptr.vmem [resolvable:$true] %s39_s12 }
   0xf   :  { %s70_s13 = scalar_lea.vmem %s40_s12, 256  ;;  %p75_p6 = scmp.lt.s32.totalorder %s40_s12, %s40_s12 }
  0x10   :  { %v25_v4 = vsub.f32 0.5, %v23_v2  ;;  %v26_v5 = vsub.f32 0.5, %v24_v3  ;;  %p71_p5 = scmp.ne.s32.totalorder %s40_s12, %s70_s13  ;;  %p76_p7 = scmp.lt.s32.totalorder %s70_s13, %s70_s13 }
  0x12   :  { %v27_v6 = vmul.f32 %v25_v4, %v21_v0  ;;  %v28_v7 = vmul.f32 %v26_v5, %v22_v1  ;;  %p77_p8 = por %p76_p7, %p75_p6 }
  0x14   :  { %v29_v8 = vadd.f32 0.25, %v27_v6  ;;  %v30_v9 = vadd.f32 0.25, %v28_v7  ;;  %p78_p9 = pnand %p77_p8, %p71_p5 }
  0x16   :  { %31 = vst [vmem:[#allocation5] sm:$0xff] %v29_v8  ;;  %32 = vst [vmem:[#allocation5 + $0x8] sm:$0xff] %v30_v9 }
  0x17   :  { %81 = shalt.err (!%p78_p9)
}
  0x18   :  { %42 = dma.vmem_to_hbm [thread:$0]  %s40_s12, 256, %s113_s1, [#allocation4]  }
  0x19   :  { %92 = dma.done.wait [#allocation4], 256  }
  0x1a   :  { %93 = vsyncadd [#allocation4], 4294967040 }
  0x1b   :  { %46 = vsyncpa [#allocation3], 1 }
  0x1c   :  { %47 = vsyncpa [#allocation4], 1 }

</bundles_post_ra>
